<compile_context>
chip_gen: v6e
topology: v6e:2x2x1
jax: 0.10.0
libtpu: 0.0.40
codegen_flags: <defaults>
</compile_context>

<pallas_src>
import math
import jax
import jax.numpy as jnp
from jax.experimental import pallas as pl
from jax.experimental.pallas import tpu as pltpu

BN_EPS = 1e-5


def treecns_kernel(tg_ref,      # VMEM (nb, N)       tree_gradient rows for this node block (f32)
                   x_ref,       # VMEM (B, N, T)     raw input, NO channel replication (f32)
                   expand_ref,  # VMEM (T, K)        theta-weighted block identity, K = T*C, k = c*T + t
                   gamma_ref,   # VMEM (nb, 1)       BN weight (per node)
                   beta_ref,    # VMEM (nb, 1)       BN bias (per node)
                   w2_ref,      # VMEM (K, TPAD)     FC weight, rows permuted to k = c*T + t, cols padded (bf16)
                   wsum_ref,    # VMEM (1, TPAD)     column sums of the (unpadded-part of) FC weight
                   bias_ref,    # VMEM (1, TPAD)     FC bias, zero-padded
                   out_ref):    # VMEM (B, nb, TPAD) f32
    B, _, T = x_ref.shape
    nb = tg_ref.shape[0]
    K = expand_ref.shape[1]

    # Shared operands loaded once; reused for every batch row (no broadcast copies).
    tg = tg_ref[...].astype(jnp.bfloat16)          # (nb, N)
    expand = expand_ref[...]                       # (T, K)  f32
    w2 = w2_ref[...]                               # (K, TPAD) bf16

    s = jnp.zeros((nb, 1), jnp.float32)
    ss = jnp.zeros((nb, 1), jnp.float32)

    # Pass 1 (statically unrolled over the small batch): tree-mix (T columns only),
    # channel-expand + Theta via the tiny expansion matmul, one dense tanh stream,
    # single-lane-reduce BN stats, and the bf16 FC dot.  The FC result is stored
    # UNSCALED into the output block; the folded BN affine is applied in pass 2.
    for b in range(B):
        xb = x_ref[b].astype(jnp.bfloat16)                                   # (N, T)
        mixed = jnp.dot(tg, xb, preferred_element_type=jnp.float32)          # (nb, T)   MXU
        pre = jnp.dot(mixed, expand, preferred_element_type=jnp.float32)     # (nb, K)   MXU (tiny)
        t2 = jnp.tanh(pre)                                                   # (nb, K)   EUP
        s = s + jnp.sum(t2, axis=-1, keepdims=True)                          # (nb, 1)   one lane reduce
        ss = ss + jnp.sum(t2 * t2, axis=-1, keepdims=True)                   # (nb, 1)
        out_ref[b] = jnp.dot(t2.astype(jnp.bfloat16), w2,
                             preferred_element_type=jnp.float32)             # (nb, TPAD) unscaled

    # BatchNorm2d(num_nodes), training stats: per-node mean/var over (batch, T, C),
    # biased variance, eps inside rsqrt.  Affine folded past the FC:
    #   out = scale * (t2 @ W) + shift * colsum(W) + bias
    inv_cnt = 1.0 / float(B * K)
    mean = s * inv_cnt
    var = ss * inv_cnt - mean * mean
    inv = jax.lax.rsqrt(var + BN_EPS)
    scale = gamma_ref[...] * inv                                             # (nb, 1)
    shift = beta_ref[...] - mean * scale                                     # (nb, 1)
    base = shift * wsum_ref[...] + bias_ref[...]                             # (nb, TPAD)
    for b in range(B):
        out_ref[b] = scale * out_ref[b] + base


def _pick_node_block(N):
    # Prefer >= 4 node blocks (then >= 2) so v7x's two TensorCores both get work;
    # nb stays a multiple of 8 for (8, 128) sublane tiling.  Tiny N falls back to one block.
    for min_blocks in (4, 2):
        for cand in (64, 32, 16, 8):
            if N % cand == 0 and N // cand >= min_blocks:
                return cand
    return N


def tree_cns_forward(NATree, X, theta1, bn_gamma, bn_beta, fc_w, fc_b, tree_w,
                     *, timesteps_output):
    B, N, T, F = X.shape
    assert F == 1, "torch.matmul(lfs, Theta1) with Theta1 (1, C) requires feature dim == 1"
    C = theta1.shape[1]
    K = T * C
    T_out = timesteps_output
    TPAD = ((T_out + 127) // 128) * 128            # lane-dense output columns

    # TODO(synk): TreeGradient module source was not provided; deterministic stand-in that
    # builds an (N, N) row-stochastic mixing matrix from NATree with learnable depth weights.
    w_depth = jax.nn.softmax(tree_w)                       # (max_node_number,)
    tg = jnp.einsum('d,idj->ij', w_depth, NATree)          # (N, N)
    tg = jax.nn.softmax(tg, axis=-1).astype(jnp.float32)

    # Wrapper-side layout plumbing (tiny, one-time):
    x3 = X[..., 0].astype(jnp.float32)                     # (B, N, T) — no channel replication
    # Theta-weighted block identity E[t', c*T + t] = theta[c] * delta(t, t') (fuses expansion + Theta1).
    expand = (jnp.eye(T, dtype=jnp.float32)[:, None, :]
              * theta1[0].astype(jnp.float32)[None, :, None]).reshape(T, K)   # (T, K)
    gamma2 = bn_gamma.astype(jnp.float32).reshape(N, 1)
    beta2 = bn_beta.astype(jnp.float32).reshape(N, 1)
    # fc_w is (T_out, 192) with 192 = T*C flattened as k = t*C + c; permute rows to c*T + t,
    # pad output columns to 128, precompute column sums for the folded BN shift term.
    w2 = jnp.transpose(fc_w.astype(jnp.float32).reshape(T_out, T, C),
                       (2, 1, 0)).reshape(K, T_out)                           # (K, T_out)
    w2p = jnp.zeros((K, TPAD), jnp.float32).at[:, :T_out].set(w2)             # (K, TPAD)
    wsum = jnp.sum(w2p, axis=0, keepdims=True)                                # (1, TPAD) f32
    w2p_bf16 = w2p.astype(jnp.bfloat16)
    fcb = jnp.zeros((1, TPAD), jnp.float32).at[:, :T_out].set(
        fc_b.astype(jnp.float32).reshape(1, T_out))                           # (1, TPAD)

    nb = _pick_node_block(N)
    grid = (N // nb,)

    cost = pl.CostEstimate(
        flops=2 * B * N * N * T + 2 * B * N * T * K + 2 * B * N * K * TPAD,
        transcendentals=B * N * K,
        bytes_accessed=(N * N * 4 + B * N * T * 4 + T * K * 4 + K * TPAD * 2
                        + B * N * TPAD * 4 + 2 * N * 4 + 2 * TPAD * 4),
    )

    out_full = pl.pallas_call(
        treecns_kernel,
        out_shape=jax.ShapeDtypeStruct((B, N, TPAD), jnp.float32),
        grid=grid,
        in_specs=[
            pl.BlockSpec((nb, N), lambda i: (i, 0)),           # tree_gradient rows (node block)
            pl.BlockSpec((B, N, T), lambda i: (0, 0, 0)),      # input, all source nodes
            pl.BlockSpec((T, K), lambda i: (0, 0)),            # theta-weighted expansion
            pl.BlockSpec((nb, 1), lambda i: (i, 0)),           # BN gamma
            pl.BlockSpec((nb, 1), lambda i: (i, 0)),           # BN beta
            pl.BlockSpec((K, TPAD), lambda i: (0, 0)),         # FC weight (bf16, padded)
            pl.BlockSpec((1, TPAD), lambda i: (0, 0)),         # FC weight column sums
            pl.BlockSpec((1, TPAD), lambda i: (0, 0)),         # FC bias (padded)
        ],
        out_specs=pl.BlockSpec((B, nb, TPAD), lambda i: (0, i, 0)),
        compiler_params=pltpu.CompilerParams(
            dimension_semantics=("parallel",),                 # node blocks are independent
            vmem_limit_bytes=32 * 1024 * 1024),
        cost_estimate=cost,
    )(tg, x3, expand, gamma2, beta2, w2p_bf16, wsum, fcb)

    return out_full[:, :, :T_out]                              # (B, N, T_out) — module layout


def tree_cns_reference(NATree, X, theta1, bn_gamma, bn_beta, fc_w, fc_b, tree_w,
                       *, timesteps_output):
    # Pure-JAX f32 reference mirroring the PyTorch forward (training-mode BatchNorm).
    w_depth = jax.nn.softmax(tree_w)
    tg = jax.nn.softmax(jnp.einsum('d,idj->ij', w_depth, NATree), axis=-1)
    lfs = jnp.einsum('ij,jklm->kilm', tg, jnp.transpose(X, (1, 0, 2, 3)))    # (B, N, T, 1)
    t2 = jnp.tanh(lfs * theta1[0][None, None, None, :])                       # (B, N, T, C)
    mean = jnp.mean(t2, axis=(0, 2, 3), keepdims=True)
    var = jnp.mean(jnp.square(t2 - mean), axis=(0, 2, 3), keepdims=True)
    out3 = (t2 - mean) / jnp.sqrt(var + BN_EPS)
    out3 = out3 * bn_gamma[:, 0][None, :, None, None] + bn_beta[:, 0][None, :, None, None]
    flat = out3.reshape(out3.shape[0], out3.shape[1], -1)                     # (B, N, 192)
    return jnp.einsum('bnk,ok->bno', flat, fc_w) + fc_b[0][None, None, :]


if __name__ == "__main__":
    num_nodes = 8
    spatial_channels = 12
    timesteps_output = 3
    max_node_number = 4
    B, T = 2, 16                     # T * spatial_channels == 192 (nn.Linear(192, ...))

    key = jax.random.PRNGKey(0)
    ks = jax.random.split(key, 8)

    # Deterministic synthetic parameters (shapes from the module __init__).
    stdv = 1.0 / math.sqrt(spatial_channels)
    theta1 = jax.random.uniform(ks[0], (1, spatial_channels), jnp.float32, -stdv, stdv)
    fan_in = T * spatial_channels    # 192
    bound = 1.0 / math.sqrt(fan_in)
    fc_w = jax.random.uniform(ks[1], (timesteps_output, fan_in), jnp.float32, -bound, bound)
    fc_b = jax.random.uniform(ks[2], (1, timesteps_output), jnp.float32, -bound, bound)
    bn_gamma = jnp.ones((num_nodes, 1), jnp.float32)
    bn_beta = jnp.zeros((num_nodes, 1), jnp.float32)
    tree_w = jax.random.normal(ks[3], (max_node_number,), jnp.float32)

    # Inputs.
    X = jax.random.normal(ks[4], (B, num_nodes, T, 1), jnp.float32)
    NATree = jax.random.uniform(ks[5], (num_nodes, max_node_number, num_nodes), jnp.float32)

    out = tree_cns_forward(NATree, X, theta1, bn_gamma, bn_beta, fc_w, fc_b, tree_w,
                           timesteps_output=timesteps_output)
    out = jax.block_until_ready(out)
    assert out.shape == (B, num_nodes, timesteps_output), out.shape

    ref = tree_cns_reference(NATree, X, theta1, bn_gamma, bn_beta, fc_w, fc_b, tree_w,
                             timesteps_output=timesteps_output)
    ref = jax.block_until_ready(ref)
    assert jnp.allclose(out, ref, rtol=2e-2, atol=2e-2), float(jnp.max(jnp.abs(out - ref)))

    print("KERNEL_OK")
</pallas_src>

<mosaic_0001>
module attributes {stable_mosaic.version = 11 : i64} {
  func.func @treecns_kernel(%arg0: i32, %arg1: memref<8x8xf32, #tpu.memory_space<vmem>>, %arg2: memref<2x8x16xf32, #tpu.memory_space<vmem>>, %arg3: memref<16x192xf32, #tpu.memory_space<vmem>>, %arg4: memref<8x1xf32, #tpu.memory_space<vmem>>, %arg5: memref<8x1xf32, #tpu.memory_space<vmem>>, %arg6: memref<192x128xbf16, #tpu.memory_space<vmem>>, %arg7: memref<1x128xf32, #tpu.memory_space<vmem>>, %arg8: memref<1x128xf32, #tpu.memory_space<vmem>>, %arg9: memref<2x8x128xf32, #tpu.memory_space<vmem>>) attributes {dimension_semantics = [#tpu.dimension_semantics<parallel>], iteration_bounds = array<i64: 1>, scalar_prefetch = 0 : i64, scratch_operands = 0 : i64, tpu.core_type = #tpu.core_type<tc>, window_params = [{transform_indices = @transform_0, window_bounds = array<i64: 8, 8>}, {pipeline_mode = #tpu.pipeline_mode<synchronous>, transform_indices = @transform_1, window_bounds = array<i64: 2, 8, 16>}, {pipeline_mode = #tpu.pipeline_mode<synchronous>, transform_indices = @transform_2, window_bounds = array<i64: 16, 192>}, {transform_indices = @transform_3, window_bounds = array<i64: 8, 1>}, {transform_indices = @transform_4, window_bounds = array<i64: 8, 1>}, {pipeline_mode = #tpu.pipeline_mode<synchronous>, transform_indices = @transform_5, window_bounds = array<i64: 192, 128>}, {pipeline_mode = #tpu.pipeline_mode<synchronous>, transform_indices = @transform_6, window_bounds = array<i64: 1, 128>}, {pipeline_mode = #tpu.pipeline_mode<synchronous>, transform_indices = @transform_7, window_bounds = array<i64: 1, 128>}, {transform_indices = @transform_8, window_bounds = array<i64: 2, 8, 128>}]} {
    %c0 = arith.constant 0 : index
    %c0_0 = arith.constant 0 : index
    %0 = vector.load %arg1[%c0, %c0_0] : memref<8x8xf32, #tpu.memory_space<vmem>>, vector<8x8xf32>
    %1 = arith.truncf %0 : vector<8x8xf32> to vector<8x8xbf16>
    %c0_1 = arith.constant 0 : index
    %c0_2 = arith.constant 0 : index
    %2 = vector.load %arg3[%c0_1, %c0_2] : memref<16x192xf32, #tpu.memory_space<vmem>>, vector<16x192xf32>
    %c0_3 = arith.constant 0 : index
    %c0_4 = arith.constant 0 : index
    %3 = vector.load %arg6[%c0_3, %c0_4] : memref<192x128xbf16, #tpu.memory_space<vmem>>, vector<192x128xbf16>
    %cst = arith.constant 0.000000e+00 : f32
    %4 = vector.broadcast %cst : f32 to vector<8x1xf32>
    %cst_5 = arith.constant 0.000000e+00 : f32
    %5 = vector.broadcast %cst_5 : f32 to vector<8x1xf32>
    %c0_6 = arith.constant 0 : index
    %c0_7 = arith.constant 0 : index
    %c0_8 = arith.constant 0 : index
    %6 = vector.load %arg2[%c0_6, %c0_7, %c0_8] : memref<2x8x16xf32, #tpu.memory_space<vmem>>, vector<1x8x16xf32>
    %7 = vector.shape_cast %6 : vector<1x8x16xf32> to vector<8x16xf32>
    %8 = arith.truncf %7 : vector<8x16xf32> to vector<8x16xbf16>
    %cst_9 = arith.constant dense<0.000000e+00> : vector<8x16xf32>
    %9 = tpu.matmul %1, %8, %cst_9 {dimension_numbers = #tpu.dot_dimension_numbers<[1], [0], [0], [1], [0, 0, 1, 1], [], []>} : vector<8x8xbf16>, vector<8x16xbf16>, vector<8x16xf32> -> vector<8x16xf32>
    %cst_10 = arith.constant dense<0.000000e+00> : vector<8x192xf32>
    %10 = tpu.matmul %9, %2, %cst_10 {dimension_numbers = #tpu.dot_dimension_numbers<[1], [0], [0], [1], [0, 0, 1, 1], [], []>} : vector<8x16xf32>, vector<16x192xf32>, vector<8x192xf32> -> vector<8x192xf32>
    %11 = math.tanh %10 : vector<8x192xf32>
    %cst_11 = arith.constant dense<0.000000e+00> : vector<8xf32>
    %12 = vector.multi_reduction <add>, %11, %cst_11 [1] : vector<8x192xf32> to vector<8xf32>
    %13 = vector.shape_cast %12 : vector<8xf32> to vector<8x1xf32>
    %14 = arith.addf %4, %13 : vector<8x1xf32>
    %15 = arith.mulf %11, %11 : vector<8x192xf32>
    %cst_12 = arith.constant dense<0.000000e+00> : vector<8xf32>
    %16 = vector.multi_reduction <add>, %15, %cst_12 [1] : vector<8x192xf32> to vector<8xf32>
    %17 = vector.shape_cast %16 : vector<8xf32> to vector<8x1xf32>
    %18 = arith.addf %5, %17 : vector<8x1xf32>
    %19 = arith.truncf %11 : vector<8x192xf32> to vector<8x192xbf16>
    %cst_13 = arith.constant dense<0.000000e+00> : vector<8x128xf32>
    %20 = tpu.matmul %19, %3, %cst_13 {dimension_numbers = #tpu.dot_dimension_numbers<[1], [0], [0], [1], [0, 0, 1, 1], [], []>} : vector<8x192xbf16>, vector<192x128xbf16>, vector<8x128xf32> -> vector<8x128xf32>
    %c0_14 = arith.constant 0 : index
    %c0_15 = arith.constant 0 : index
    %c0_16 = arith.constant 0 : index
    %21 = vector.load %arg9[%c0_14, %c0_15, %c0_16] : memref<2x8x128xf32, #tpu.memory_space<vmem>>, vector<1x8x128xf32>
    %22 = vector.shape_cast %21 : vector<1x8x128xf32> to vector<8x128xf32>
    %23 = vector.shape_cast %20 : vector<8x128xf32> to vector<1x8x128xf32>
    tpu.vector_store %arg9[%c0_14, %c0_15, %c0_16], %23 {strides = array<i32>} : memref<2x8x128xf32, #tpu.memory_space<vmem>>, vector<1x8x128xf32>,
    %c1 = arith.constant 1 : index
    %c0_17 = arith.constant 0 : index
    %c0_18 = arith.constant 0 : index
    %24 = vector.load %arg2[%c1, %c0_17, %c0_18] : memref<2x8x16xf32, #tpu.memory_space<vmem>>, vector<1x8x16xf32>
    %25 = vector.shape_cast %24 : vector<1x8x16xf32> to vector<8x16xf32>
    %26 = arith.truncf %25 : vector<8x16xf32> to vector<8x16xbf16>
    %cst_19 = arith.constant dense<0.000000e+00> : vector<8x16xf32>
    %27 = tpu.matmul %1, %26, %cst_19 {dimension_numbers = #tpu.dot_dimension_numbers<[1], [0], [0], [1], [0, 0, 1, 1], [], []>} : vector<8x8xbf16>, vector<8x16xbf16>, vector<8x16xf32> -> vector<8x16xf32>
    %cst_20 = arith.constant dense<0.000000e+00> : vector<8x192xf32>
    %28 = tpu.matmul %27, %2, %cst_20 {dimension_numbers = #tpu.dot_dimension_numbers<[1], [0], [0], [1], [0, 0, 1, 1], [], []>} : vector<8x16xf32>, vector<16x192xf32>, vector<8x192xf32> -> vector<8x192xf32>
    %29 = math.tanh %28 : vector<8x192xf32>
    %cst_21 = arith.constant dense<0.000000e+00> : vector<8xf32>
    %30 = vector.multi_reduction <add>, %29, %cst_21 [1] : vector<8x192xf32> to vector<8xf32>
    %31 = vector.shape_cast %30 : vector<8xf32> to vector<8x1xf32>
    %32 = arith.addf %14, %31 : vector<8x1xf32>
    %33 = arith.mulf %29, %29 : vector<8x192xf32>
    %cst_22 = arith.constant dense<0.000000e+00> : vector<8xf32>
    %34 = vector.multi_reduction <add>, %33, %cst_22 [1] : vector<8x192xf32> to vector<8xf32>
    %35 = vector.shape_cast %34 : vector<8xf32> to vector<8x1xf32>
    %36 = arith.addf %18, %35 : vector<8x1xf32>
    %37 = arith.truncf %29 : vector<8x192xf32> to vector<8x192xbf16>
    %cst_23 = arith.constant dense<0.000000e+00> : vector<8x128xf32>
    %38 = tpu.matmul %37, %3, %cst_23 {dimension_numbers = #tpu.dot_dimension_numbers<[1], [0], [0], [1], [0, 0, 1, 1], [], []>} : vector<8x192xbf16>, vector<192x128xbf16>, vector<8x128xf32> -> vector<8x128xf32>
    %c1_24 = arith.constant 1 : index
    %c0_25 = arith.constant 0 : index
    %c0_26 = arith.constant 0 : index
    %39 = vector.load %arg9[%c1_24, %c0_25, %c0_26] : memref<2x8x128xf32, #tpu.memory_space<vmem>>, vector<1x8x128xf32>
    %40 = vector.shape_cast %39 : vector<1x8x128xf32> to vector<8x128xf32>
    %41 = vector.shape_cast %38 : vector<8x128xf32> to vector<1x8x128xf32>
    tpu.vector_store %arg9[%c1_24, %c0_25, %c0_26], %41 {strides = array<i32>} : memref<2x8x128xf32, #tpu.memory_space<vmem>>, vector<1x8x128xf32>,
    %cst_27 = arith.constant 0.00260416674 : f32
    %42 = vector.broadcast %cst_27 : f32 to vector<8x1xf32>
    %43 = arith.mulf %32, %42 : vector<8x1xf32>
    %cst_28 = arith.constant 0.00260416674 : f32
    %44 = vector.broadcast %cst_28 : f32 to vector<8x1xf32>
    %45 = arith.mulf %36, %44 : vector<8x1xf32>
    %46 = arith.mulf %43, %43 : vector<8x1xf32>
    %47 = arith.subf %45, %46 : vector<8x1xf32>
    %cst_29 = arith.constant 9.99999974E-6 : f32
    %48 = vector.broadcast %cst_29 : f32 to vector<8x1xf32>
    %49 = arith.addf %47, %48 : vector<8x1xf32>
    %50 = math.rsqrt %49 : vector<8x1xf32>
    %c0_30 = arith.constant 0 : index
    %c0_31 = arith.constant 0 : index
    %51 = vector.load %arg4[%c0_30, %c0_31] : memref<8x1xf32, #tpu.memory_space<vmem>>, vector<8x1xf32>
    %52 = arith.mulf %51, %50 : vector<8x1xf32>
    %c0_32 = arith.constant 0 : index
    %c0_33 = arith.constant 0 : index
    %53 = vector.load %arg5[%c0_32, %c0_33] : memref<8x1xf32, #tpu.memory_space<vmem>>, vector<8x1xf32>
    %54 = arith.mulf %43, %52 : vector<8x1xf32>
    %55 = arith.subf %53, %54 : vector<8x1xf32>
    %c0_34 = arith.constant 0 : index
    %c0_35 = arith.constant 0 : index
    %56 = vector.load %arg7[%c0_34, %c0_35] : memref<1x128xf32, #tpu.memory_space<vmem>>, vector<1x128xf32>
    %57 = vector.broadcast %55 : vector<8x1xf32> to vector<8x128xf32>
    %58 = vector.broadcast %56 : vector<1x128xf32> to vector<8x128xf32>
    %59 = arith.mulf %57, %58 : vector<8x128xf32>
    %c0_36 = arith.constant 0 : index
    %c0_37 = arith.constant 0 : index
    %60 = vector.load %arg8[%c0_36, %c0_37] : memref<1x128xf32, #tpu.memory_space<vmem>>, vector<1x128xf32>
    %61 = vector.broadcast %60 : vector<1x128xf32> to vector<8x128xf32>
    %62 = arith.addf %59, %61 : vector<8x128xf32>
    %c0_38 = arith.constant 0 : index
    %c0_39 = arith.constant 0 : index
    %c0_40 = arith.constant 0 : index
    %63 = vector.load %arg9[%c0_38, %c0_39, %c0_40] : memref<2x8x128xf32, #tpu.memory_space<vmem>>, vector<1x8x128xf32>
    %64 = vector.shape_cast %63 : vector<1x8x128xf32> to vector<8x128xf32>
    %65 = vector.broadcast %52 : vector<8x1xf32> to vector<8x128xf32>
    %66 = arith.mulf %65, %64 : vector<8x128xf32>
    %67 = arith.addf %66, %62 : vector<8x128xf32>
    %c0_41 = arith.constant 0 : index
    %c0_42 = arith.constant 0 : index
    %c0_43 = arith.constant 0 : index
    %68 = vector.load %arg9[%c0_41, %c0_42, %c0_43] : memref<2x8x128xf32, #tpu.memory_space<vmem>>, vector<1x8x128xf32>
    %69 = vector.shape_cast %68 : vector<1x8x128xf32> to vector<8x128xf32>
    %70 = vector.shape_cast %67 : vector<8x128xf32> to vector<1x8x128xf32>
    tpu.vector_store %arg9[%c0_41, %c0_42, %c0_43], %70 {strides = array<i32>} : memref<2x8x128xf32, #tpu.memory_space<vmem>>, vector<1x8x128xf32>,
    %c1_44 = arith.constant 1 : index
    %c0_45 = arith.constant 0 : index
    %c0_46 = arith.constant 0 : index
    %71 = vector.load %arg9[%c1_44, %c0_45, %c0_46] : memref<2x8x128xf32, #tpu.memory_space<vmem>>, vector<1x8x128xf32>
    %72 = vector.shape_cast %71 : vector<1x8x128xf32> to vector<8x128xf32>
    %73 = vector.broadcast %52 : vector<8x1xf32> to vector<8x128xf32>
    %74 = arith.mulf %73, %72 : vector<8x128xf32>
    %75 = arith.addf %74, %62 : vector<8x128xf32>
    %c1_47 = arith.constant 1 : index
    %c0_48 = arith.constant 0 : index
    %c0_49 = arith.constant 0 : index
    %76 = vector.load %arg9[%c1_47, %c0_48, %c0_49] : memref<2x8x128xf32, #tpu.memory_space<vmem>>, vector<1x8x128xf32>
    %77 = vector.shape_cast %76 : vector<1x8x128xf32> to vector<8x128xf32>
    %78 = vector.shape_cast %75 : vector<8x128xf32> to vector<1x8x128xf32>
    tpu.vector_store %arg9[%c1_47, %c0_48, %c0_49], %78 {strides = array<i32>} : memref<2x8x128xf32, #tpu.memory_space<vmem>>, vector<1x8x128xf32>,
    return
  }
  func.func @transform_0(%arg0: i32) -> (i32, i32) {
    %c0_i32 = arith.constant 0 : i32
    %c0_i32_0 = arith.constant 0 : i32
    return %arg0, %c0_i32 : i32, i32
  }
  func.func @transform_1(%arg0: i32) -> (i32, i32, i32) {
    %c0_i32 = arith.constant 0 : i32
    %c0_i32_0 = arith.constant 0 : i32
    %c0_i32_1 = arith.constant 0 : i32
    %c0_i32_2 = arith.constant 0 : i32
    return %c0_i32, %c0_i32_0, %c0_i32_1 : i32, i32, i32
  }
  func.func @transform_2(%arg0: i32) -> (i32, i32) {
    %c0_i32 = arith.constant 0 : i32
    %c0_i32_0 = arith.constant 0 : i32
    %c0_i32_1 = arith.constant 0 : i32
    return %c0_i32, %c0_i32_0 : i32, i32
  }
  func.func @transform_3(%arg0: i32) -> (i32, i32) {
    %c0_i32 = arith.constant 0 : i32
    %c0_i32_0 = arith.constant 0 : i32
    return %arg0, %c0_i32 : i32, i32
  }
  func.func @transform_4(%arg0: i32) -> (i32, i32) {
    %c0_i32 = arith.constant 0 : i32
    %c0_i32_0 = arith.constant 0 : i32
    return %arg0, %c0_i32 : i32, i32
  }
  func.func @transform_5(%arg0: i32) -> (i32, i32) {
    %c0_i32 = arith.constant 0 : i32
    %c0_i32_0 = arith.constant 0 : i32
    %c0_i32_1 = arith.constant 0 : i32
    return %c0_i32, %c0_i32_0 : i32, i32
  }
  func.func @transform_6(%arg0: i32) -> (i32, i32) {
    %c0_i32 = arith.constant 0 : i32
    %c0_i32_0 = arith.constant 0 : i32
    %c0_i32_1 = arith.constant 0 : i32
    return %c0_i32, %c0_i32_0 : i32, i32
  }
  func.func @transform_7(%arg0: i32) -> (i32, i32) {
    %c0_i32 = arith.constant 0 : i32
    %c0_i32_0 = arith.constant 0 : i32
    %c0_i32_1 = arith.constant 0 : i32
    return %c0_i32, %c0_i32_0 : i32, i32
  }
  func.func @transform_8(%arg0: i32) -> (i32, i32, i32) {
    %c0_i32 = arith.constant 0 : i32
    %c0_i32_0 = arith.constant 0 : i32
    %c0_i32_1 = arith.constant 0 : i32
    return %c0_i32, %arg0, %c0_i32_0 : i32, i32, i32
  }
}

</mosaic_0001>

<bundles_post_ra>
// kernel: tpu_custom_call.1
= control target key start
LH: loop header
LB: loop body
LE: loop exit
PB: predicated region body
PF: predicated region fallthrough
CT: control target
= control target key end

     0   :  { %13 = vsyncpa [#allocation3], 0  ;;  %s912_s0 = inlined_call_operand.hbm [shape: f32[8,8], index: 0, kind: input, shape index: {}]   ;;  %s913_s1 = inlined_call_operand.vmem [shape: f32[2,8,16], index: 1, kind: input, shape index: {}]   ;;  %s914_s2 = inlined_call_operand.hbm [shape: f32[16,192], index: 2, kind: input, shape index: {}]   ;;  %s915_s3 = inlined_call_operand.vmem [shape: f32[8,1], index: 3, kind: input, shape index: {}]   ;;  %s916_s4 = inlined_call_operand.vmem [shape: f32[8,1], index: 4, kind: input, shape index: {}]   ;;  %s917_s5 = inlined_call_operand.hbm [shape: bf16[192,128], index: 5, kind: input, shape index: {}]   ;;  %s918_s6 = inlined_call_operand.vmem [shape: f32[1,128], index: 6, kind: input, shape index: {}]   ;;  %s919_s7 = inlined_call_operand.vmem [shape: f32[1,128], index: 7, kind: input, shape index: {}]   ;;  %s920_s8 = inlined_call_operand.hbm [shape: f32[2,8,128], index: 8, kind: output, shape index: {}]  }
   0x1   :  { %14 = vsyncpa [#allocation6], 0 }
   0x2   :  { %15 = vsyncpa [#allocation4], 0  ;;  %s762_s27 = smov [#allocation5]  }
   0x3   :  { %s33_s28 = sshll.u32 %s762_s27, 4  ;;  %s34_s28 = int_to_ptr.vmem [resolvable:$true] %s33_s28 }
   0x4   :  { %s684_s29 = scalar_lea.vmem %s34_s28, 512  ;;  %p689_p1 = scmp.lt.s32.totalorder %s34_s28, %s34_s28 }
   0x5   :  { %p685_p0 = scmp.ne.s32.totalorder %s34_s28, %s684_s29  ;;  %p690_p2 = scmp.lt.s32.totalorder %s684_s29, %s684_s29 }
   0x7   :  { %p691_p3 = por %p690_p2, %p689_p1 }
   0x9   :  { %p692_p4 = pnand %p691_p3, %p685_p0 }
   0xb   :  { %695 = shalt.err (!%p692_p4)
}
   0xc   :  { %s763_s30 = smov 256   ;;  %s764_s9 = smov 16  }
   0xd   :  { %39 = dma.hbm_to_vmem [thread:$0]  %s914_s2, 512, %s34_s28, [#allocation6], %s763_s30, %s763_s30, %s764_s9  }
   0xe   :  { %s765_s12 = smov [#allocation2]   ;;  %s766_s14 = smov [#allocation7]  }
   0xf   :  { %s22_s13 = sshll.u32 %s765_s12, 4  ;;  %s49_s15 = sshll.u32 %s766_s14, 4  ;;  %s23_s13 = int_to_ptr.vmem [resolvable:$true] %s22_s13  ;;  %s50_s15 = int_to_ptr.vmem [resolvable:$true] %s49_s15 }
  0x10   :  { %s704_s16 = scalar_lea.vmem %s23_s13, 128  ;;  %p709_p6 = scmp.lt.s32.totalorder %s23_s13, %s23_s13 }
  0x11   :  { %p705_p5 = scmp.ne.s32.totalorder %s23_s13, %s704_s16  ;;  %p710_p7 = scmp.lt.s32.totalorder %s704_s16, %s704_s16 }
  0x13   :  { %p711_p8 = por %p710_p7, %p709_p6 }
  0x15   :  { %p712_p9 = pnand %p711_p8, %p705_p5 }
  0x17   :  { %715 = shalt.err (!%p712_p9)
}
  0x18   :  { %25 = dma.hbm_to_vmem [thread:$0]  %s912_s0, 128, %s23_s13, [#allocation3]  }
  0x19   :  { %s724_s19 = scalar_lea.vmem %s50_s15, 1536  ;;  %p729_p11 = scmp.lt.s32.totalorder %s50_s15, %s50_s15 }
  0x1a   :  { %p725_p10 = scmp.ne.s32.totalorder %s50_s15, %s724_s19  ;;  %p730_p12 = scmp.lt.s32.totalorder %s724_s19, %s724_s19 }
  0x1c   :  { %p731_p13 = por %p730_p12, %p729_p11 }
  0x1e   :  { %p732_p0 = pnand %p731_p13, %p725_p10 }
  0x20   :  { %735 = shalt.err (!%p732_p0)
}
  0x21   :  { %s767_s2 = smov 64   ;;  %s768_s20 = smov 4  }
  0x22   :  { %55 = dma.hbm_to_vmem [thread:$0]  %s917_s5, 1536, %s50_s15, [#allocation6], %s767_s2, %s767_s2, %s768_s20  }
  0x23   :  { %756 = dma.done.wait [#allocation3], 128  }
  0x24   :  { %757 = vsyncadd [#allocation3], 4294967168 }
  0x25   :  { %758 = dma.done.wait [#allocation6], 2048  }
  0x26   :  { %759 = vsyncadd [#allocation6], 4294965248  ;;  %v769_v0 = vmov 0.0   ;;  %vm770_vm0 = vmmov 0   ;;  %v100_v1 = vld [vmem:[%s913_s1] sm:$0xff]  ;;  %vm106_vm1 = vcmask 1043456  }
  0x27   :  { %627 = vmatprep.subr.bf16.mxu0 %v769_v0  ;;  %629 = vmatprep.mubr.msk.bf16.mxu0 %vm770_vm0, %v769_v0  ;;  %v70_v2 = vld [vmem:[#allocation2] sm:$0xff]  ;;  %v101_v3 = vpack.c.bf16 %v100_v1, %v100_v1  ;;  %v838_v5 = vld [vmem:[#allocation5 + $0x10] sm:$0xff]  ;;  %v840_v6 = vld [vmem:[#allocation5 + $0x8] sm:$0xff]  ;;  %vm102_vm2 = vcmask 64512   ;;  %v771_v11 = vmov 0   ;;  %vm150_vm3 = vcmask 130048  }
  0x28   :  { %218 = vmatprep.mubr.f32.mxu1 %v769_v0  ;;  %v836_v4 = vld [vmem:[#allocation5 + $0x18] sm:$0xff]  ;;  %v71_v8 = vpack.c.bf16 %v70_v2, %v70_v2  ;;  %v847_v9 = vld [vmem:[#allocation5] sm:$0xff]  ;;  %653 = vset.pattern.permute.xlu1 %v771_v11  ;;  %v655_v12 = vld [vmem:[#allocation7 + $0x30] sm:$0xff]   ;;  %vm227_vm4 = vcmask 523264  }
  0x29   :  { %182 = vmatprep.subr.mxu1 %v836_v4  ;;  %v108_v7 = vsel %vm106_vm1, %v101_v3, 0  ;;  %v654_v10 = vld [vmem:[#allocation7 + $0x38] sm:$0xff]   ;;  %652 = vset.pattern.permute.xlu0 %v771_v11  ;;  %v656_v13 = vld [vmem:[#allocation7 + $0x28] sm:$0xff]   ;;  %v657_v14 = vld [vmem:[#allocation7 + $0x20] sm:$0xff]  }
  0x2a   :  { %183 = vmatpush1.msra.mxu1 %v838_v5  ;;  %628 = vmatpush3.bf16.msra.mxu0 %v108_v7  ;;  %v658_v15 = vld [vmem:[#allocation7 + $0x18] sm:$0xff]   ;;  %v659_v16 = vld [vmem:[#allocation7 + $0x10] sm:$0xff]   ;;  %v660_v17 = vld [vmem:[#allocation7 + $0x8] sm:$0xff]  }
  0x2b   :  { %184 = vmatprep.subr.mxu1 %v840_v6  ;;  %317 = vmatprep.subr.bf16.mxu0 %v771_v11  ;;  %v617_v18 = vld [vmem:[%s913_s1 + $0x8] sm:$0xff]  ;;  %v662_v26 = vld [vmem:[#allocation7 + $0x58] sm:$0xff]   ;;  %v663_v27 = vld [vmem:[#allocation7 + $0x50] sm:$0xff]  }
  0x2c   :  { %185 = vmatpush1.msra.mxu1 %v847_v9  ;;  %v360_v19 = vpack.c.bf16 %v617_v18, %v617_v18  ;;  %v661_v25 = vld [vmem:[#allocation7] sm:$0xff]   ;;  %v664_v28 = vld [vmem:[#allocation7 + $0x48] sm:$0xff]  }
  0x2d   :  { %630 = vmatmul.mubr.msk.bf16.vlgmr.msra.gmra.mxu0 %vm102_vm2, %v71_v8  ;;  %633 = vmatprep.subr.bf16.mxu1 %v769_v0  ;;  %v665_v29 = vld [vmem:[#allocation7 + $0x40] sm:$0xff]  }
  0x2e   :  { %318 = vmatpush1.bf16.msra.mxu0 %v654_v10  ;;  %v362_v20 = vsel %vm106_vm1, %v360_v19, 0  ;;  %v621_v19 = vld [vmem:[%s918_s6] ss:$0 sm:$0xff] }
  0x2f   :  { %319 = vmatprep.subr.bf16.mxu0 %v771_v11 }
  0x32   :  { %320 = vmatpush1.bf16.msra.mxu0 %v655_v12 }
  0x33   :  { %321 = vmatprep.subr.bf16.mxu0 %v771_v11 }
  0x36   :  { %322 = vmatpush1.bf16.msra.mxu0 %v656_v13 }
  0x37   :  { %323 = vmatprep.subr.bf16.mxu0 %v771_v11 }
  0x3a   :  { %324 = vmatpush1.bf16.msra.mxu0 %v657_v14 }
  0x3b   :  { %325 = vmatprep.subr.bf16.mxu0 %v771_v11 }
  0x3e   :  { %326 = vmatpush1.bf16.msra.mxu0 %v658_v15 }
  0x3f   :  { %327 = vmatprep.subr.bf16.mxu0 %v771_v11 }
  0x42   :  { %328 = vmatpush1.bf16.msra.mxu0 %v659_v16 }
  0x43   :  { %329 = vmatprep.subr.bf16.mxu0 %v771_v11 }
  0x46   :  { %330 = vmatpush1.bf16.msra.mxu0 %v660_v17 }
  0x47   :  { %331 = vmatprep.subr.bf16.mxu0 %v771_v11 }
  0x4a   :  { %332 = vmatpush1.bf16.msra.mxu0 %v661_v25 }
  0x4b   :  { %341 = vmatprep.subr.bf16.mxu0 %v771_v11 }
  0x4e   :  { %342 = vmatpush2.bf16.msra.mxu0 %v662_v26 }
  0x4f   :  { %343 = vmatprep.subr.bf16.mxu0 %v771_v11 }
  0x52   :  { %344 = vmatpush2.bf16.msra.mxu0 %v663_v27 }
  0x53   :  { %345 = vmatprep.subr.bf16.mxu0 %v771_v11 }
  0x56   :  { %346 = vmatpush2.bf16.msra.mxu0 %v664_v28 }
  0x57   :  { %347 = vmatprep.subr.bf16.mxu0 %v771_v11 }
  0x5a   :  { %348 = vmatpush2.bf16.msra.mxu0 %v665_v29 }
  0x5b   :  { %435 = vmatprep.subr.mxu0 %v836_v4 }
  0xed   :  { %v144_v21 = vpop.f32.mrf.mxu0 }
  0xee   :  { %603 = vmatmul.mubr.msk.f32.vlgmr.msra.gmra.mxu1 %vm150_vm3, %v144_v21  ;;  %v622_v21 = vld [vmem:[%s919_s7] ss:$0 sm:$0xff] }
  0xef   :  { %v631_v22 = vpop.f32.mrf.mxu0  ;;  %634 = vmatpush3.bf16.msra.mxu1 %v362_v20  ;;  %635 = vmatprep.mubr.msk.bf16.mxu1 %vm770_vm0, %v769_v0 }
  0xf0   :  { %497 = vmatprep.subr.bf16.mxu1 %v771_v11 }
  0xf1   :  { %v147_v23 = vpop.f32.mrf.mxu0 }
  0xf2   :  { %636 = vmatmul.mubr.msk.bf16.vlgmr.msra.gmra.mxu1 %vm102_vm2, %v71_v8 }
  0xf3   :  { %v632_v24 = vpop.f32.mrf.mxu0  ;;  %498 = vmatpush1.bf16.msra.mxu1 %v654_v10 }
  0xf4   :  { %499 = vmatprep.subr.bf16.mxu1 %v771_v11 }
  0xf7   :  { %500 = vmatpush1.bf16.msra.mxu1 %v655_v12  ;;  %v547_v12 = vld [vmem:[%s916_s4] sm:$0xff]  ;;  %s772_s4 = smov [#allocation8]  }
  0xf8   :  { %501 = vmatprep.subr.bf16.mxu1 %v771_v11  ;;  %s589_s9 = sshll.u32 %s772_s4, 4  ;;  %s590_s9 = int_to_ptr.vmem [resolvable:$true] %s589_s9 }
  0xf9   :  { %s736_s10 = scalar_lea.vmem %s590_s9, 256  ;;  %p741_p2 = scmp.lt.s32.totalorder %s590_s9, %s590_s9 }
  0xfa   :  { %p737_p1 = scmp.ne.s32.totalorder %s590_s9, %s736_s10  ;;  %p742_p3 = scmp.lt.s32.totalorder %s736_s10, %s736_s10 }
  0xfb   :  { %502 = vmatpush1.bf16.msra.mxu1 %v656_v13 }
  0xfc   :  { %503 = vmatprep.subr.bf16.mxu1 %v771_v11  ;;  %p743_p4 = por %p742_p3, %p741_p2 }
  0xfe   :  { %p744_p5 = pnand %p743_p4, %p737_p1 }
  0xff   :  { %504 = vmatpush1.bf16.msra.mxu1 %v657_v14 }
 0x100   :  { %505 = vmatprep.subr.bf16.mxu1 %v771_v11 }
 0x103   :  { %506 = vmatpush1.bf16.msra.mxu1 %v658_v15 }
 0x104   :  { %507 = vmatprep.subr.bf16.mxu1 %v771_v11 }
 0x107   :  { %508 = vmatpush1.bf16.msra.mxu1 %v659_v16 }
 0x108   :  { %509 = vmatprep.subr.bf16.mxu1 %v771_v11 }
 0x10b   :  { %510 = vmatpush1.bf16.msra.mxu1 %v660_v17 }
 0x10c   :  { %511 = vmatprep.subr.bf16.mxu1 %v771_v11 }
 0x10f   :  { %512 = vmatpush1.bf16.msra.mxu1 %v661_v25 }
 0x110   :  { %521 = vmatprep.subr.bf16.mxu1 %v771_v11 }
 0x113   :  { %522 = vmatpush2.bf16.msra.mxu1 %v662_v26 }
 0x114   :  { %523 = vmatprep.subr.bf16.mxu1 %v771_v11 }
 0x117   :  { %524 = vmatpush2.bf16.msra.mxu1 %v663_v27 }
 0x118   :  { %525 = vmatprep.subr.bf16.mxu1 %v771_v11 }
 0x11b   :  { %526 = vmatpush2.bf16.msra.mxu1 %v664_v28 }
 0x11c   :  { %527 = vmatprep.subr.bf16.mxu1 %v771_v11 }
 0x11f   :  { %528 = vmatpush2.bf16.msra.mxu1 %v665_v29 }
 0x1ae   :  { %v220_v30 = vpop.f32.mrf.mxu1 }
 0x1af   :  { %666 = vtanh.f32 %v220_v30 }
 0x1b0   :  { %v222_v31 = vpop.f32.mrf.mxu1 }
 0x1b1   :  { %668 = vtanh.f32 %v222_v31 }
 0x1b2   :  { %v398_v32 = vpop.f32.mrf.mxu1 }
 0x1b4   :  { %v637_v33 = vpop.f32.mrf.mxu1 }
 0x1b6   :  { %v401_v34 = vpop.f32.mrf.mxu1 }
 0x1b8   :  { %v638_v35 = vpop.f32.mrf.mxu1 }
 0x1bc   :  { %v667_v36 = vpop.eup %666 }
 0x1bd   :  { %v240_v41 = vpack.c.bf16 %v667_v36, %v667_v36  ;;  %v233_v43 = vmul.f32 %v667_v36, %v667_v36 }
 0x1be   :  { %v669_v37 = vpop.eup %668 }
 0x1bf   :  { %v241_v38 = vpack.c.bf16 %v669_v37, %v669_v37  ;;  %v228_v39 = vsel %vm227_vm4, %v669_v37, 0.0  ;;  %v234_v40 = vmul.f32 %v669_v37, %v669_v37 }
 0x1c0   :  { %v229_v42 = vadd.f32 %v667_v36, %v228_v39 }
 0x1c1   :  { %616 = vmatprep.mubr.msk.bf16.mxu0 %vm227_vm4, %v241_v38  ;;  %v235_v44 = vsel %vm227_vm4, %v234_v40, 0.0 }
 0x1c2   :  { %350 = vmatmul.mubr.bf16.vlgmr.msra.gmra.mxu0 %v240_v41  ;;  %230 = vadd.xlane.f32.xlu0 %v229_v42  ;;  %v236_v45 = vadd.f32 %v235_v44, %v233_v43 }
 0x1c3   :  { %436 = vmatpush1.msra.mxu0 %v838_v5  ;;  %471 = vmatprep.mubr.f32.mxu0 %v769_v0 }
 0x1c4   :  { %237 = vadd.xlane.f32.xlu1 %v236_v45  ;;  %437 = vmatprep.subr.mxu0 %v840_v6 }
 0x1c5   :  { %438 = vmatpush1.msra.mxu0 %v847_v9  ;;  %v545_v9 = vld [vmem:[%s915_s3] sm:$0xff] }
 0x1ca   :  { %619 = vmatmul.mubr.msk.f32.vlgmr.msra.gmra.mxu0 %vm150_vm3, %v398_v32 }
 0x24b   :  { %v231_v62 = vpop.xlane.xlu0 %230 }
 0x24d   :  { %v238_v63 = vpop.xlane.xlu1 %237 }
 0x282   :  { %v351_v46 = vpop.f32.mrf.mxu0 }
 0x284   :  { %v353_v47 = vpop.f32.mrf.mxu0 }
 0x286   :  { %v354_v48 = vpop.f32.mrf.mxu0 }
 0x288   :  { %v355_v49 = vpop.f32.mrf.mxu0 }
 0x28a   :  { %v473_v50 = vpop.f32.mrf.mxu0 }
 0x28b   :  { %670 = vtanh.f32 %v473_v50 }
 0x28c   :  { %v475_v51 = vpop.f32.mrf.mxu0 }
 0x28d   :  { %672 = vtanh.f32 %v475_v51 }
 0x298   :  { %v671_v52 = vpop.eup %670 }
 0x299   :  { %v492_v57 = vpack.c.bf16 %v671_v52, %v671_v52  ;;  %v485_v59 = vmul.f32 %v671_v52, %v671_v52 }
 0x29a   :  { %v673_v53 = vpop.eup %672 }
 0x29b   :  { %v493_v54 = vpack.c.bf16 %v673_v53, %v673_v53  ;;  %v480_v55 = vsel %vm227_vm4, %v673_v53, 0.0  ;;  %v486_v56 = vmul.f32 %v673_v53, %v673_v53 }
 0x29c   :  { %v481_v58 = vadd.f32 %v671_v52, %v480_v55 }
 0x29d   :  { %620 = vmatprep.mubr.msk.bf16.mxu1 %vm227_vm4, %v493_v54  ;;  %v487_v60 = vsel %vm227_vm4, %v486_v56, 0.0 }
 0x29e   :  { %530 = vmatmul.mubr.bf16.vlgmr.msra.gmra.mxu1 %v492_v57  ;;  %482 = vadd.xlane.f32.xlu0 %v481_v58  ;;  %v488_v61 = vadd.f32 %v487_v60, %v485_v59 }
 0x2a0   :  { %489 = vadd.xlane.f32.xlu1 %v488_v61 }
 0x327   :  { %v483_v0 = vpop.xlane.xlu0 %482 }
 0x328   :  { %v484_v1 = vadd.f32 %v483_v0, %v231_v62 }
 0x329   :  { %v490_v2 = vpop.xlane.xlu1 %489 }
 0x32a   :  { %v539_v3 = vmul.f32 0.0026041667, %v484_v1  ;;  %v491_v4 = vadd.f32 %v490_v2, %v238_v63 }
 0x32c   :  { %v541_v5 = vmul.f32 %v539_v3, %v539_v3  ;;  %v540_v6 = vmul.f32 0.0026041667, %v491_v4 }
 0x32e   :  { %v542_v7 = vsub.f32 %v540_v6, %v541_v5 }
 0x330   :  { %v543_v8 = vadd.f32 1e-05, %v542_v7 }
 0x332   :  { %674 = vrsqrt.f32 %v543_v8 }
 0x33f   :  { %v675_v10 = vpop.eup %674 }
 0x340   :  { %v546_v11 = vmul.f32 %v675_v10, %v545_v9 }
 0x342   :  { %574 = vperm.xlu1 %653, %v546_v11   ;;  %v548_v13 = vmul.f32 %v546_v11, %v539_v3 }
 0x344   :  { %v549_v14 = vsub.f32 %v547_v12, %v548_v13 }
 0x346   :  { %553 = vperm.xlu0 %652, %v549_v14  }
 0x35e   :  { %v531_v15 = vpop.f32.mrf.mxu1 }
 0x360   :  { %v533_v16 = vpop.f32.mrf.mxu1 }
 0x362   :  { %v534_v17 = vpop.f32.mrf.mxu1 }
 0x364   :  { %v535_v18 = vpop.f32.mrf.mxu1 }
 0x3bd   :  { %v575_v20 = vpop.permute.xlu1 %574 }
 0x3be   :  { %v577_v24 = vmul.f32 %v575_v20, %v351_v46  ;;  %v581_v25 = vmul.f32 %v575_v20, %v531_v15 }
 0x3c1   :  { %v554_v22 = vpop.permute.xlu0 %553 }
 0x3c2   :  { %v562_v23 = vmul.f32 %v621_v19, %v554_v22 }
 0x3c4   :  { %v570_v26 = vadd.f32 %v622_v21, %v562_v23 }
 0x3c6   :  { %v578_v27 = vadd.f32 %v577_v24, %v570_v26  ;;  %v582_v28 = vadd.f32 %v581_v25, %v570_v26 }
 0x3c8   :  { %579 = vst [vmem:[#allocation8] sm:$0xff] %v578_v27  ;;  %583 = vst [vmem:[#allocation8 + $0x8] sm:$0xff] %v582_v28 }
 0x3c9   :  { %747 = shalt.err (!%p744_p5)
}
 0x3ca   :  { %s773_s6 = smov 128   ;;  %s774_s7 = smov 8  }
 0x3cb   :  { %595 = dma.vmem_to_hbm [thread:$0]  %s590_s9, 256, %s920_s8, [#allocation4], %s773_s6, %s773_s6, %s774_s7  }
 0x3cc   :  { %760 = dma.done.wait [#allocation4], 256  }
 0x3cd   :  { %761 = vsyncadd [#allocation4], 4294967040 }
 0x3ce   :  { %599 = vsyncpa [#allocation3], 1 }
 0x3cf   :  { %600 = vsyncpa [#allocation6], 1 }
 0x3d0   :  { %601 = vsyncpa [#allocation4], 1 }

</bundles_post_ra>
